<compile_context>
chip_gen: v6e
topology: v6e:2x2x1
jax: 0.10.0
libtpu: 0.0.40
codegen_flags: <defaults>
</compile_context>

<pallas_src>
import functools

import jax
import jax.numpy as jnp
from jax.experimental import pallas as pl
from jax.experimental.pallas import tpu as pltpu

_EPS = 1e-16
_LANES = 128
_SUBLANES = 8


def _choose_rows_tile(R, C, p_itemsize, w_itemsize, vmem_budget_bytes=12 * 1024 * 1024):
    """Pick a sublane-row tile (multiple of 8 that divides R) such that
    (a) double-buffered pipeline tiles + in-kernel f32 temporaries stay under
        `vmem_budget_bytes`, and
    (b) there are >= ~4 reduction steps so input DMA overlaps compute."""
    lane_bytes = _LANES
    per_row = (
        2 * (2 * C * lane_bytes * p_itemsize)      # p0/p1 blocks, double-buffered
        + 2 * (2 * lane_bytes * w_itemsize)        # wk block (2 planes), double-buffered
        + 2 * (2 * lane_bytes * 4)                 # two f32 accumulator outputs, double-buffered
        + (6 * C + 10) * lane_bytes * 4            # in-kernel f32 temporaries (upcasts, mix, logs, ...)
    )
    cap = max(_SUBLANES, (vmem_budget_bytes // per_row) // _SUBLANES * _SUBLANES)
    if R >= 4 * _SUBLANES:
        # keep at least ~4 reduction steps for DMA/compute overlap
        cap = min(cap, max(_SUBLANES, (R // 4) // _SUBLANES * _SUBLANES))
    cap = min(cap, R)
    for t in range(cap, _SUBLANES - 1, -_SUBLANES):
        if R % t == 0:
            return t
    return _SUBLANES  # unreachable: R is a multiple of 8 after padding


def _choose_spatial_splits(B, nj_total):
    """v7x has two TensorCores: give the grid >= 2 parallel units even at B == 1."""
    if B >= 2 or nj_total < 2 or nj_total % 2:
        return 1
    return 2


def _gjsd_kernel(p0_ref, p1_ref, w_ref, t1_ref, t2_ref):
    # p*_ref : (C, rows_tile, 128) block
    # w_ref  : (2, rows_tile, 128) block (w0 = w_ref[0], w1 = w_ref[1])
    # t*_ref : (rows_tile, 128) f32 accumulator blocks, resident across the j axis
    j = pl.program_id(2)

    @pl.when(j == 0)
    def _():
        t1_ref[...] = jnp.zeros_like(t1_ref)
        t2_ref[...] = jnp.zeros_like(t2_ref)

    p0 = p0_ref[...].astype(jnp.float32)
    p1 = p1_ref[...].astype(jnp.float32)
    w0 = w_ref[0].astype(jnp.float32)
    w1 = w_ref[1].astype(jnp.float32)

    # Per-distribution entropies, reduced over the (leading) channel axis:
    # dense VALU adds, no cross-lane/sublane reduce.
    ent0 = -jnp.sum(p0 * jnp.log(p0 + _EPS), axis=0)   # (rows_tile, 128)
    ent1 = -jnp.sum(p1 * jnp.log(p1 + _EPS), axis=0)   # (rows_tile, 128)

    # Weighted mixture: one exact reciprocal instead of two divides
    # (do NOT switch to approx=True: it feeds log(mix)).
    inv = pl.reciprocal(w0 + w1, approx=False)          # (rows_tile, 128)
    r0 = w0 * inv
    r1 = w1 * inv
    mix = r0[None] * p0 + r1[None] * p1                 # (C, rows_tile, 128)
    h_mix = -jnp.sum(mix * jnp.log(mix + _EPS), axis=0)  # (rows_tile, 128)

    # Lane/sublane-wise accumulation across the reduction axis.
    t1_ref[...] += h_mix
    t2_ref[...] += w0 * ent0 + w1 * ent1                 # the /2 is folded into the wrapper


@functools.partial(jax.jit, static_argnames=("rows_tile",))
def gjsd_div(p0, p1, wk, rows_tile=None):
    """Pallas GJSD. p0, p1: [B, C, H, W] probabilities; wk: [2, B, H, W]."""
    B, C, H, W = p0.shape
    HW = H * W
    N = B * HW

    # Pad the flattened spatial axis up to a multiple of 8*128 so the last two
    # dims are a dense (sublane, lane) grid.  Padded pixels use p = 0, w = 1 and
    # contribute exactly 0 to both sums.
    HW_pad = -(-HW // (_SUBLANES * _LANES)) * (_SUBLANES * _LANES)
    pad = HW_pad - HW
    R = HW_pad // _LANES

    p0_r = p0.reshape(B, C, HW)
    p1_r = p1.reshape(B, C, HW)
    w_r = wk.reshape(2, B, HW)          # single contiguous operand (no wk[0]/wk[1] slices)
    if pad:
        p0_r = jnp.pad(p0_r, ((0, 0), (0, 0), (0, pad)))
        p1_r = jnp.pad(p1_r, ((0, 0), (0, 0), (0, pad)))
        w_r = jnp.pad(w_r, ((0, 0), (0, 0), (0, pad)), constant_values=1.0)
    p0_r = p0_r.reshape(B, C, R, _LANES)
    p1_r = p1_r.reshape(B, C, R, _LANES)
    w_r = w_r.reshape(2, B, R, _LANES)

    if rows_tile is None:
        rows_tile = _choose_rows_tile(
            R, C, jnp.dtype(p0.dtype).itemsize, jnp.dtype(wk.dtype).itemsize)
    assert R % rows_tile == 0, "rows_tile must divide the padded row count"
    assert rows_tile % _SUBLANES == 0 or rows_tile == R

    nj_total = R // rows_tile
    S = _choose_spatial_splits(B, nj_total)   # extra parallel units for v7x at small B
    nj = nj_total // S
    grid = (S, B, nj)                          # reduction axis last

    p_spec = pl.BlockSpec((None, C, rows_tile, _LANES),
                          lambda s, b, j: (b, 0, s * nj + j, 0))
    w_spec = pl.BlockSpec((2, None, rows_tile, _LANES),
                          lambda s, b, j: (0, b, s * nj + j, 0))
    # Per-(split, batch) lane/sublane-dense partial-sum accumulators, revisited across j.
    acc_spec = pl.BlockSpec((None, None, rows_tile, _LANES),
                            lambda s, b, j: (s, b, 0, 0))

    t1_part, t2_part = pl.pallas_call(
        _gjsd_kernel,
        out_shape=(
            jax.ShapeDtypeStruct((S, B, rows_tile, _LANES), jnp.float32),
            jax.ShapeDtypeStruct((S, B, rows_tile, _LANES), jnp.float32),
        ),
        grid_spec=pltpu.PrefetchScalarGridSpec(
            num_scalar_prefetch=0,
            grid=grid,
            in_specs=[p_spec, p_spec, w_spec],
            out_specs=(acc_spec, acc_spec),
        ),
        compiler_params=pltpu.CompilerParams(
            # split / batch axes shard across TensorCores (v7x); reduction axis last
            dimension_semantics=("parallel", "parallel", "arbitrary"),
            vmem_limit_bytes=32 * 1024 * 1024,
        ),
    )(p0_r, p1_r, w_r)

    # Final tree-reduce + mean in the wrapper; /2 for term2 folded in here.
    term1 = jnp.sum(t1_part) / N
    term2 = jnp.sum(t2_part) / (2.0 * N)
    return term1, term2


def gjsd_div_ref(p0, p1, wk, eps=_EPS):
    """Pure-JAX reference matching the PyTorch module (reduction='mean')."""
    ent = lambda p: -jnp.sum(p * jnp.log(p + eps), axis=1)  # [B, H, W]
    e0, e1 = ent(p0), ent(p1)
    w0, w1 = wk[0], wk[1]
    wsum = w0 + w1
    mix = (w0 / wsum)[:, None] * p0 + (w1 / wsum)[:, None] * p1
    term1 = ent(mix).mean()
    term2 = ((w0 * e0 + w1 * e1) / 2.0).mean()
    return term1, term2


if __name__ == "__main__":
    key = jax.random.PRNGKey(0)

    # --- test 1: small shape, exercises spatial padding (256 -> 1024 pixels) ---
    B, C, H, W = 2, 4, 16, 16
    k1, k2, k3 = jax.random.split(key, 3)
    p0 = jax.nn.softmax(jax.random.normal(k1, (B, C, H, W), jnp.float32), axis=1)
    p1 = jax.nn.softmax(jax.random.normal(k2, (B, C, H, W), jnp.float32), axis=1)
    wk = jax.random.uniform(k3, (2, B, H, W), jnp.float32, minval=0.25, maxval=1.0)

    t1, t2 = gjsd_div(p0, p1, wk)
    jax.block_until_ready((t1, t2))
    r1, r2 = gjsd_div_ref(p0, p1, wk)
    assert jnp.allclose(t1, r1, rtol=1e-5, atol=1e-6), (t1, r1)
    assert jnp.allclose(t2, r2, rtol=1e-5, atol=1e-6), (t2, r2)

    # --- test 2: B=1 -> spatial split axis + multi-step accumulation along j ---
    B2, C2, H2, W2 = 1, 4, 64, 64
    k4, k5, k6 = jax.random.split(jax.random.PRNGKey(1), 3)
    q0 = jax.nn.softmax(jax.random.normal(k4, (B2, C2, H2, W2), jnp.float32), axis=1)
    q1 = jax.nn.softmax(jax.random.normal(k5, (B2, C2, H2, W2), jnp.float32), axis=1)
    wq = jax.random.uniform(k6, (2, B2, H2, W2), jnp.float32, minval=0.25, maxval=1.0)

    s1, s2 = gjsd_div(q0, q1, wq)
    jax.block_until_ready((s1, s2))
    u1, u2 = gjsd_div_ref(q0, q1, wq)
    assert jnp.allclose(s1, u1, rtol=1e-5, atol=1e-6), (s1, u1)
    assert jnp.allclose(s2, u2, rtol=1e-5, atol=1e-6), (s2, u2)

    # --- test 3: odd C, non-divisible H*W, explicit rows_tile ---
    B3, C3, H3, W3 = 2, 3, 32, 48
    k7, k8, k9 = jax.random.split(jax.random.PRNGKey(2), 3)
    z0 = jax.nn.softmax(jax.random.normal(k7, (B3, C3, H3, W3), jnp.float32), axis=1)
    z1 = jax.nn.softmax(jax.random.normal(k8, (B3, C3, H3, W3), jnp.float32), axis=1)
    wz = jax.random.uniform(k9, (2, B3, H3, W3), jnp.float32, minval=0.25, maxval=1.0)

    v1, v2 = gjsd_div(z0, z1, wz, rows_tile=8)   # padded R = 16 -> 2 j-steps per batch
    jax.block_until_ready((v1, v2))
    w1_, w2_ = gjsd_div_ref(z0, z1, wz)
    assert jnp.allclose(v1, w1_, rtol=1e-5, atol=1e-6), (v1, w1_)
    assert jnp.allclose(v2, w2_, rtol=1e-5, atol=1e-6), (v2, w2_)

    print("KERNEL_OK")
</pallas_src>

<mosaic_0001>
module attributes {stable_mosaic.version = 11 : i64} {
  func.func @_gjsd_kernel(%arg0: i32, %arg1: i32, %arg2: i32, %arg3: memref<1x4x8x128xf32, #tpu.memory_space<vmem>>, %arg4: memref<1x4x8x128xf32, #tpu.memory_space<vmem>>, %arg5: memref<2x1x8x128xf32, #tpu.memory_space<vmem>>, %arg6: memref<1x1x8x128xf32, #tpu.memory_space<vmem>>, %arg7: memref<1x1x8x128xf32, #tpu.memory_space<vmem>>) attributes {dimension_semantics = [#tpu.dimension_semantics<parallel>, #tpu.dimension_semantics<parallel>, #tpu.dimension_semantics<arbitrary>], iteration_bounds = array<i64: 1, 2, 1>, scalar_prefetch = 0 : i64, scratch_operands = 0 : i64, tpu.core_type = #tpu.core_type<tc>, window_params = [{transform_indices = @transform_0, window_bounds = array<i64: 1, 4, 8, 128>}, {transform_indices = @transform_1, window_bounds = array<i64: 1, 4, 8, 128>}, {transform_indices = @transform_2, window_bounds = array<i64: 2, 1, 8, 128>}, {transform_indices = @transform_3, window_bounds = array<i64: 1, 1, 8, 128>}, {transform_indices = @transform_4, window_bounds = array<i64: 1, 1, 8, 128>}]} {
    %c0_i32 = arith.constant 0 : i32
    %0 = arith.cmpi eq, %arg2, %c0_i32 : i32
    %1 = arith.extui %0 : i1 to i32
    %c0_i32_0 = arith.constant 0 : i32
    %2 = arith.cmpi ne, %1, %c0_i32_0 : i32
    scf.if %2 {
      %cst_39 = arith.constant 0.000000e+00 : f32
      %58 = vector.broadcast %cst_39 : f32 to vector<8x128xf32>
      %c0_40 = arith.constant 0 : index
      %c0_41 = arith.constant 0 : index
      %c0_42 = arith.constant 0 : index
      %c0_43 = arith.constant 0 : index
      %59 = vector.load %arg6[%c0_40, %c0_41, %c0_42, %c0_43] : memref<1x1x8x128xf32, #tpu.memory_space<vmem>>, vector<1x1x8x128xf32>
      %60 = vector.shape_cast %59 : vector<1x1x8x128xf32> to vector<8x128xf32>
      %61 = vector.shape_cast %58 : vector<8x128xf32> to vector<1x1x8x128xf32>
      tpu.vector_store %arg6[%c0_40, %c0_41, %c0_42, %c0_43], %61 {strides = array<i32>} : memref<1x1x8x128xf32, #tpu.memory_space<vmem>>, vector<1x1x8x128xf32>,
      %cst_44 = arith.constant 0.000000e+00 : f32
      %62 = vector.broadcast %cst_44 : f32 to vector<8x128xf32>
      %c0_45 = arith.constant 0 : index
      %c0_46 = arith.constant 0 : index
      %c0_47 = arith.constant 0 : index
      %c0_48 = arith.constant 0 : index
      %63 = vector.load %arg7[%c0_45, %c0_46, %c0_47, %c0_48] : memref<1x1x8x128xf32, #tpu.memory_space<vmem>>, vector<1x1x8x128xf32>
      %64 = vector.shape_cast %63 : vector<1x1x8x128xf32> to vector<8x128xf32>
      %65 = vector.shape_cast %62 : vector<8x128xf32> to vector<1x1x8x128xf32>
      tpu.vector_store %arg7[%c0_45, %c0_46, %c0_47, %c0_48], %65 {strides = array<i32>} : memref<1x1x8x128xf32, #tpu.memory_space<vmem>>, vector<1x1x8x128xf32>,
    } else {
    }
    %c0 = arith.constant 0 : index
    %c0_1 = arith.constant 0 : index
    %c0_2 = arith.constant 0 : index
    %c0_3 = arith.constant 0 : index
    %3 = vector.load %arg3[%c0, %c0_1, %c0_2, %c0_3] : memref<1x4x8x128xf32, #tpu.memory_space<vmem>>, vector<1x4x8x128xf32>
    %4 = vector.shape_cast %3 : vector<1x4x8x128xf32> to vector<4x8x128xf32>
    %c0_4 = arith.constant 0 : index
    %c0_5 = arith.constant 0 : index
    %c0_6 = arith.constant 0 : index
    %c0_7 = arith.constant 0 : index
    %5 = vector.load %arg4[%c0_4, %c0_5, %c0_6, %c0_7] : memref<1x4x8x128xf32, #tpu.memory_space<vmem>>, vector<1x4x8x128xf32>
    %6 = vector.shape_cast %5 : vector<1x4x8x128xf32> to vector<4x8x128xf32>
    %c0_8 = arith.constant 0 : index
    %c0_9 = arith.constant 0 : index
    %c0_10 = arith.constant 0 : index
    %c0_11 = arith.constant 0 : index
    %7 = vector.load %arg5[%c0_8, %c0_9, %c0_10, %c0_11] : memref<2x1x8x128xf32, #tpu.memory_space<vmem>>, vector<1x1x8x128xf32>
    %8 = vector.shape_cast %7 : vector<1x1x8x128xf32> to vector<8x128xf32>
    %c1 = arith.constant 1 : index
    %c0_12 = arith.constant 0 : index
    %c0_13 = arith.constant 0 : index
    %c0_14 = arith.constant 0 : index
    %9 = vector.load %arg5[%c1, %c0_12, %c0_13, %c0_14] : memref<2x1x8x128xf32, #tpu.memory_space<vmem>>, vector<1x1x8x128xf32>
    %10 = vector.shape_cast %9 : vector<1x1x8x128xf32> to vector<8x128xf32>
    %cst = arith.constant 1.000000e-16 : f32
    %11 = vector.broadcast %cst : f32 to vector<4x8x128xf32>
    %12 = arith.addf %4, %11 : vector<4x8x128xf32>
    %13 = math.log %12 : vector<4x8x128xf32>
    %14 = arith.mulf %4, %13 : vector<4x8x128xf32>
    %cst_15 = arith.constant dense<0.000000e+00> : vector<8x128xf32>
    %15 = vector.multi_reduction <add>, %14, %cst_15 [0] : vector<4x8x128xf32> to vector<8x128xf32>
    %cst_16 = arith.constant 0.000000e+00 : f32
    %16 = vector.broadcast %cst_16 : f32 to vector<8x128xf32>
    %17 = arith.subf %16, %15 : vector<8x128xf32>
    %cst_17 = arith.constant 1.000000e-16 : f32
    %18 = vector.broadcast %cst_17 : f32 to vector<4x8x128xf32>
    %19 = arith.addf %6, %18 : vector<4x8x128xf32>
    %20 = math.log %19 : vector<4x8x128xf32>
    %21 = arith.mulf %6, %20 : vector<4x8x128xf32>
    %cst_18 = arith.constant dense<0.000000e+00> : vector<8x128xf32>
    %22 = vector.multi_reduction <add>, %21, %cst_18 [0] : vector<4x8x128xf32> to vector<8x128xf32>
    %cst_19 = arith.constant 0.000000e+00 : f32
    %23 = vector.broadcast %cst_19 : f32 to vector<8x128xf32>
    %24 = arith.subf %23, %22 : vector<8x128xf32>
    %25 = arith.addf %8, %10 : vector<8x128xf32>
    %26 = tpu.reciprocal %25 : vector<8x128xf32> -> vector<8x128xf32>
    %27 = arith.mulf %8, %26 : vector<8x128xf32>
    %28 = arith.mulf %10, %26 : vector<8x128xf32>
    %29 = vector.shape_cast %27 : vector<8x128xf32> to vector<1x8x128xf32>
    %30 = vector.broadcast %29 : vector<1x8x128xf32> to vector<4x8x128xf32>
    %31 = arith.mulf %30, %4 : vector<4x8x128xf32>
    %32 = vector.shape_cast %28 : vector<8x128xf32> to vector<1x8x128xf32>
    %33 = vector.broadcast %32 : vector<1x8x128xf32> to vector<4x8x128xf32>
    %34 = arith.mulf %33, %6 : vector<4x8x128xf32>
    %35 = arith.addf %31, %34 : vector<4x8x128xf32>
    %cst_20 = arith.constant 1.000000e-16 : f32
    %36 = vector.broadcast %cst_20 : f32 to vector<4x8x128xf32>
    %37 = arith.addf %35, %36 : vector<4x8x128xf32>
    %38 = math.log %37 : vector<4x8x128xf32>
    %39 = arith.mulf %35, %38 : vector<4x8x128xf32>
    %cst_21 = arith.constant dense<0.000000e+00> : vector<8x128xf32>
    %40 = vector.multi_reduction <add>, %39, %cst_21 [0] : vector<4x8x128xf32> to vector<8x128xf32>
    %cst_22 = arith.constant 0.000000e+00 : f32
    %41 = vector.broadcast %cst_22 : f32 to vector<8x128xf32>
    %42 = arith.subf %41, %40 : vector<8x128xf32>
    %c0_23 = arith.constant 0 : index
    %c0_24 = arith.constant 0 : index
    %c0_25 = arith.constant 0 : index
    %c0_26 = arith.constant 0 : index
    %43 = vector.load %arg6[%c0_23, %c0_24, %c0_25, %c0_26] : memref<1x1x8x128xf32, #tpu.memory_space<vmem>>, vector<1x1x8x128xf32>
    %44 = vector.shape_cast %43 : vector<1x1x8x128xf32> to vector<8x128xf32>
    %45 = arith.addf %44, %42 : vector<8x128xf32>
    %c0_27 = arith.constant 0 : index
    %c0_28 = arith.constant 0 : index
    %c0_29 = arith.constant 0 : index
    %c0_30 = arith.constant 0 : index
    %46 = vector.load %arg6[%c0_27, %c0_28, %c0_29, %c0_30] : memref<1x1x8x128xf32, #tpu.memory_space<vmem>>, vector<1x1x8x128xf32>
    %47 = vector.shape_cast %46 : vector<1x1x8x128xf32> to vector<8x128xf32>
    %48 = vector.shape_cast %45 : vector<8x128xf32> to vector<1x1x8x128xf32>
    tpu.vector_store %arg6[%c0_27, %c0_28, %c0_29, %c0_30], %48 {strides = array<i32>} : memref<1x1x8x128xf32, #tpu.memory_space<vmem>>, vector<1x1x8x128xf32>,
    %c0_31 = arith.constant 0 : index
    %c0_32 = arith.constant 0 : index
    %c0_33 = arith.constant 0 : index
    %c0_34 = arith.constant 0 : index
    %49 = vector.load %arg7[%c0_31, %c0_32, %c0_33, %c0_34] : memref<1x1x8x128xf32, #tpu.memory_space<vmem>>, vector<1x1x8x128xf32>
    %50 = vector.shape_cast %49 : vector<1x1x8x128xf32> to vector<8x128xf32>
    %51 = arith.mulf %8, %17 : vector<8x128xf32>
    %52 = arith.mulf %10, %24 : vector<8x128xf32>
    %53 = arith.addf %51, %52 : vector<8x128xf32>
    %54 = arith.addf %50, %53 : vector<8x128xf32>
    %c0_35 = arith.constant 0 : index
    %c0_36 = arith.constant 0 : index
    %c0_37 = arith.constant 0 : index
    %c0_38 = arith.constant 0 : index
    %55 = vector.load %arg7[%c0_35, %c0_36, %c0_37, %c0_38] : memref<1x1x8x128xf32, #tpu.memory_space<vmem>>, vector<1x1x8x128xf32>
    %56 = vector.shape_cast %55 : vector<1x1x8x128xf32> to vector<8x128xf32>
    %57 = vector.shape_cast %54 : vector<8x128xf32> to vector<1x1x8x128xf32>
    tpu.vector_store %arg7[%c0_35, %c0_36, %c0_37, %c0_38], %57 {strides = array<i32>} : memref<1x1x8x128xf32, #tpu.memory_space<vmem>>, vector<1x1x8x128xf32>,
    return
  }
  func.func @transform_0(%arg0: i32, %arg1: i32, %arg2: i32) -> (i32, i32, i32, i32) {
    %c1_i32 = arith.constant 1 : i32
    %0 = arith.muli %arg0, %c1_i32 : i32
    %1 = arith.addi %0, %arg2 : i32
    %c0_i32 = arith.constant 0 : i32
    %c0_i32_0 = arith.constant 0 : i32
    %c0_i32_1 = arith.constant 0 : i32
    return %arg1, %c0_i32, %1, %c0_i32_0 : i32, i32, i32, i32
  }
  func.func @transform_1(%arg0: i32, %arg1: i32, %arg2: i32) -> (i32, i32, i32, i32) {
    %c1_i32 = arith.constant 1 : i32
    %0 = arith.muli %arg0, %c1_i32 : i32
    %1 = arith.addi %0, %arg2 : i32
    %c0_i32 = arith.constant 0 : i32
    %c0_i32_0 = arith.constant 0 : i32
    %c0_i32_1 = arith.constant 0 : i32
    return %arg1, %c0_i32, %1, %c0_i32_0 : i32, i32, i32, i32
  }
  func.func @transform_2(%arg0: i32, %arg1: i32, %arg2: i32) -> (i32, i32, i32, i32) {
    %c1_i32 = arith.constant 1 : i32
    %0 = arith.muli %arg0, %c1_i32 : i32
    %1 = arith.addi %0, %arg2 : i32
    %c0_i32 = arith.constant 0 : i32
    %c0_i32_0 = arith.constant 0 : i32
    %c0_i32_1 = arith.constant 0 : i32
    return %c0_i32, %arg1, %1, %c0_i32_0 : i32, i32, i32, i32
  }
  func.func @transform_3(%arg0: i32, %arg1: i32, %arg2: i32) -> (i32, i32, i32, i32) {
    %c0_i32 = arith.constant 0 : i32
    %c0_i32_0 = arith.constant 0 : i32
    %c0_i32_1 = arith.constant 0 : i32
    return %arg0, %arg1, %c0_i32, %c0_i32_0 : i32, i32, i32, i32
  }
  func.func @transform_4(%arg0: i32, %arg1: i32, %arg2: i32) -> (i32, i32, i32, i32) {
    %c0_i32 = arith.constant 0 : i32
    %c0_i32_0 = arith.constant 0 : i32
    %c0_i32_1 = arith.constant 0 : i32
    return %arg0, %arg1, %c0_i32, %c0_i32_0 : i32, i32, i32, i32
  }
}

</mosaic_0001>

<bundles_post_ra>
// kernel: gjsd_div.1
= control target key start
LH: loop header
LB: loop body
LE: loop exit
PB: predicated region body
PF: predicated region fallthrough
CT: control target
= control target key end

     0   :  { %s792_s15 = smov 0   ;;  %s794_s16 = smov 0   ;;  %s896_s0 = inlined_call_operand.vmem [shape: f32[2,4,8,128], index: 0, kind: input, shape index: {}]   ;;  %s897_s1 = inlined_call_operand.vmem [shape: f32[2,4,8,128], index: 1, kind: input, shape index: {}]   ;;  %s898_s2 = inlined_call_operand.vmem [shape: f32[2,2,8,128], index: 2, kind: input, shape index: {}]   ;;  %s899_s3 = inlined_call_operand.vmem [shape: f32[1,2,8,128], index: 3, kind: output, shape index: {0}]   ;;  %s900_s4 = inlined_call_operand.vmem [shape: f32[1,2,8,128], index: 4, kind: output, shape index: {1}]  }
   0x1   :  { %s796_s17 = smov 0   ;;  %s798_s18 = smov 0  }
   0x2   :  { %s800_s19 = smov 0  }
   0x3 LB: > { %s30_s20 = sadd.s32 1, %s761_s18  ;;  %p112_p1 = scmp.ne.s32.totalorder %s753_s16, %s749_s15  ;;  %s765_s19 = sphi %s800_s19, %s15_s19   ;;  %s761_s18 = sphi %s798_s18, %s904_s18   ;;  %s757_s17 = sphi %s796_s17, %s903_s17   ;;  %s753_s16 = sphi %s794_s16, %s902_s16   ;;  %s749_s15 = sphi %s792_s15, %s901_s15  }
   0x4   : > { %p32_p0 = scmp.ge.s32.totalorder %s30_s20, 2  ;;  %p113_p2 = scmp.eq.s32.totalorder %s765_s19, 0 }
   0x5   : > { %s105_s22 = sadd.s32 1, %s753_s16  ;;  %p644_p5 = scmp.ge.s32.totalorder %s765_s19, 2 }
   0x6   : > { %s906_s20 = smov (%p32_p0, %s30_s20), 0  ;;  %p114_p3 = por %p113_p2, %p112_p1 }
   0x7   : > { %s100_s21 = ssub.s32 %s761_s18, %s906_s20  ;;  %194 = sbr.rel (%p644_p5) target bundleno = 17 (0x11), region = 16 }
   0x8   : > { %p103_p4 = scmp.eq.s32.totalorder %s100_s21, 0 }
   0xa   : > { %s827_s23 = scalar_select %p103_p4, %s753_s16, %s105_s22  }
   0xc   : > { %223 = sbr.rel (!%p114_p3) target bundleno = 17 (0x11), region = 28  ;;  %s225_s24 = sand.u32 (%p114_p3), 1, %s753_s16  }
   0xd   : > { %s646_s25 = sshll.u32 (%p114_p3), %s761_s18, 3  ;;  %s645_s26 = sshll.u32 (%p114_p3), %s225_s24, 4 }
   0xe   : > { %s231_s29 = scalar_lea.vmem (%p114_p3), %s898_s2, %s646_s25  ;;  %s227_s30 = scalar_lea.vmem (%p114_p3), [#allocation2], %s645_s26 }
   0xf   : > { %v262_v0 = vld [vmem:[%s231_s29] sm:$0xff] (%p114_p3)  ;;  %v264_v1 = vld [vmem:[%s231_s29 + $0x10] sm:$0xff] (%p114_p3) }
  0x10   : > { %263 = vst [vmem:[%s227_s30] sm:$0xff] (%p114_p3), %v262_v0  ;;  %265 = vst [vmem:[%s227_s30 + $0x8] sm:$0xff] (%p114_p3), %v264_v1 }
  0x11 PF: > { %p647_p6 = scmp.ge.s32.totalorder %s765_s19, 1  ;;  %p270_p7 = scmp.lt.s32.totalorder %s765_s19, 3 }
  0x13   : > { %p271_p8 = pnand %p647_p6, %p270_p7 }
  0x14   : > { %s277_s5 = sand.u32 (!%p271_p8), 1, %s749_s15   ;;  %p332_p9 = scmp.lt.s32.totalorder (!%p271_p8), %s757_s17, 1 }
  0x15   : > { %274 = sbr.rel (%p271_p8) target bundleno = 79 (0x4f), region = 66  ;;  %s648_s6 = sshll.u32 (!%p271_p8), %s277_s5, 4 }
  0x16   : > { %s279_s7 = scalar_lea.vmem (!%p271_p8), [#allocation2], %s648_s6 }
  0x1a   : > { %s908_s17 = smov (!%p332_p9, %s757_s17), 1  ;;  %v842_v2 = vld [vmem:[%s279_s7] sm:$0xff]  ;;  %v844_v3 = vld [vmem:[%s279_s7 + $0x8] sm:$0xff] }
  0x1b   : > { %v425_v4 = vadd.f32 %v844_v3, %v842_v2  ;;  %s658_s8 = sshll.u32 %s908_s17, 5  ;;  %s653_s15 = sshll.u32 %s908_s17, 3 }
  0x1c   : > { %s339_s11 = scalar_lea.vmem %s896_s0, %s658_s8  ;;  %s349_s14 = scalar_lea.vmem %s897_s1, %s658_s8 }
  0x1d   : > { %701 = vrcp.f32 %v425_v4  ;;  %v374_v5 = vld [vmem:[%s339_s11] sm:$0xff]  ;;  %v375_v6 = vld [vmem:[%s339_s11 + $0x8] sm:$0xff]  ;;  %v376_v7 = vld [vmem:[%s339_s11 + $0x10] sm:$0xff]  ;;  %s367_s24 = scalar_lea.vmem %s900_s4, %s653_s15  ;;  %s359_s26 = scalar_lea.vmem %s899_s3, %s653_s15 }
  0x1e   : > { %v855_v8 = vld [vmem:[%s339_s11 + $0x18] sm:$0xff]  ;;  %v378_v9 = vld [vmem:[%s349_s14] sm:$0xff]  ;;  %v379_v10 = vld [vmem:[%s349_s14 + $0x8] sm:$0xff]  ;;  %v385_v11 = vadd.f32 1e-16, %v374_v5 }
  0x1f   : > { %v857_v12 = vld [vmem:[%s349_s14 + $0x10] sm:$0xff]  ;;  %v386_v13 = vadd.f32 1e-16, %v375_v6  ;;  %v387_v14 = vadd.f32 1e-16, %v376_v7  ;;  %v859_v15 = vld [vmem:[%s349_s14 + $0x18] sm:$0xff] }
  0x20   : > { %v388_v16 = vadd.f32 1e-16, %v855_v8  ;;  %703 = vlog2.f32 %v385_v11  ;;  %v405_v17 = vadd.f32 1e-16, %v378_v9  ;;  %v406_v18 = vadd.f32 1e-16, %v379_v10 }
  0x21   : > { %705 = vlog2.f32 %v386_v13  ;;  %v407_v19 = vadd.f32 1e-16, %v857_v12  ;;  %v408_v20 = vadd.f32 1e-16, %v859_v15 }
  0x22   : > { %707 = vlog2.f32 %v387_v14 }
  0x23   : > { %709 = vlog2.f32 %v388_v16 }
  0x24   : > { %711 = vlog2.f32 %v405_v17 }
  0x25   : > { %713 = vlog2.f32 %v406_v18 }
  0x26   : > { %715 = vlog2.f32 %v407_v19 }
  0x27   : > { %717 = vlog2.f32 %v408_v20 }
  0x2a   : > { %v702_v21 = vpop.eup %701 }
  0x2b   : > { %v427_v22 = vmul.f32 %v702_v21, %v842_v2  ;;  %v428_v23 = vmul.f32 %v702_v21, %v844_v3 }
  0x2d   : > { %v429_v24 = vmul.f32 %v427_v22, %v374_v5  ;;  %v430_v25 = vmul.f32 %v427_v22, %v375_v6  ;;  %v431_v26 = vmul.f32 %v427_v22, %v376_v7  ;;  %v433_v27 = vmul.f32 %v428_v23, %v378_v9  ;;  %v704_v28 = vpop.eup %703 }
  0x2e   : > { %v434_v29 = vmul.f32 %v428_v23, %v379_v10  ;;  %v435_v30 = vmul.f32 %v428_v23, %v857_v12  ;;  %v432_v31 = vmul.f32 %v427_v22, %v855_v8  ;;  %v436_v32 = vmul.f32 %v428_v23, %v859_v15  ;;  %v706_v33 = vpop.eup %705 }
  0x2f   : > { %v390_v34 = vmul.f32 0.6931472, %v704_v28  ;;  %v437_v35 = vadd.f32 %v433_v27, %v429_v24  ;;  %v708_v36 = vpop.eup %707  ;;  %v392_v37 = vmul.f32 0.6931472, %v706_v33 }
  0x30   : > { %v438_v38 = vadd.f32 %v434_v29, %v430_v25  ;;  %v439_v39 = vadd.f32 %v435_v30, %v431_v26  ;;  %v440_v40 = vadd.f32 %v436_v32, %v432_v31  ;;  %v710_v41 = vpop.eup %709  ;;  %v394_v42 = vmul.f32 0.6931472, %v708_v36 }
  0x31   : > { %v397_v43 = vmul.f32 %v390_v34, %v374_v5  ;;  %v441_v44 = vadd.f32 1e-16, %v437_v35  ;;  %v712_v45 = vpop.eup %711  ;;  %v398_v46 = vmul.f32 %v392_v37, %v375_v6  ;;  %v396_v53 = vmul.f32 0.6931472, %v710_v41 }
  0x32   : > { %v442_v47 = vadd.f32 1e-16, %v438_v38  ;;  %v443_v48 = vadd.f32 1e-16, %v439_v39  ;;  %v444_v49 = vadd.f32 1e-16, %v440_v40  ;;  %v714_v50 = vpop.eup %713  ;;  %v399_v51 = vmul.f32 %v394_v42, %v376_v7 }
  0x33   : > { %v410_v52 = vmul.f32 0.6931472, %v712_v45  ;;  %719 = vlog2.f32 %v441_v44  ;;  %v716_v54 = vpop.eup %715  ;;  %v412_v55 = vmul.f32 0.6931472, %v714_v50  ;;  %v401_v56 = vadd.f32 %v398_v46, %v397_v43 }
  0x34   : > { %721 = vlog2.f32 %v442_v47  ;;  %v718_v57 = vpop.eup %717  ;;  %v414_v58 = vmul.f32 0.6931472, %v716_v54  ;;  %v400_v60 = vmul.f32 %v396_v53, %v855_v8 }
  0x35   : > { %v417_v59 = vmul.f32 %v410_v52, %v378_v9  ;;  %723 = vlog2.f32 %v443_v48  ;;  %v418_v61 = vmul.f32 %v412_v55, %v379_v10  ;;  %v402_v62 = vadd.f32 %v401_v56, %v399_v51 }
  0x36   : > { %725 = vlog2.f32 %v444_v49  ;;  %v416_v63 = vmul.f32 0.6931472, %v718_v57  ;;  %v419_v0 = vmul.f32 %v414_v58, %v857_v12 }
  0x37   : > { %v403_v1 = vadd.f32 %v402_v62, %v400_v60  ;;  %v421_v5 = vadd.f32 %v418_v61, %v417_v59 }
  0x38   : > { %v420_v4 = vmul.f32 %v416_v63, %v859_v15 }
  0x39   : > { %v404_v6 = vsub.f32 0.0, %v403_v1  ;;  %v422_v7 = vadd.f32 %v421_v5, %v419_v0 }
  0x3b   : > { %v423_v11 = vadd.f32 %v422_v7, %v420_v4  ;;  %v465_v9 = vmul.f32 %v404_v6, %v842_v2 }
  0x3d   : > { %v424_v13 = vsub.f32 0.0, %v423_v11 }
  0x3f   : > { %v466_v8 = vmul.f32 %v844_v3, %v424_v13 }
  0x40   : > { %v720_v14 = vpop.eup %719 }
  0x41   : > { %v722_v10 = vpop.eup %721  ;;  %v446_v16 = vmul.f32 0.6931472, %v720_v14  ;;  %v467_v19 = vadd.f32 %v466_v8, %v465_v9 }
  0x42   : > { %v724_v17 = vpop.eup %723  ;;  %v448_v18 = vmul.f32 0.6931472, %v722_v10 }
  0x43   : > { %v726_v12 = vpop.eup %725  ;;  %v450_v15 = vmul.f32 0.6931472, %v724_v17  ;;  %v453_v20 = vmul.f32 %v446_v16, %v437_v35  ;;  %469 = vst [vmem:[%s367_s24] sm:$0xff] %v467_v19 }
  0x44   : > { %v452_v21 = vmul.f32 0.6931472, %v726_v12  ;;  %v454_v22 = vmul.f32 %v448_v18, %v438_v38 }
  0x45   : > { %v455_v23 = vmul.f32 %v450_v15, %v439_v39 }
  0x46   : > { %v456_v2 = vmul.f32 %v452_v21, %v440_v40  ;;  %v457_v24 = vadd.f32 %v454_v22, %v453_v20 }
  0x48   : > { %v458_v25 = vadd.f32 %v457_v24, %v455_v23 }
  0x4a   : > { %v459_v3 = vadd.f32 %v458_v25, %v456_v2 }
  0x4c   : > { %v460_v26 = vsub.f32 0.0, %v459_v3 }
  0x4e   : > { %463 = vst [vmem:[%s359_s26] sm:$0xff] %v460_v26 }
  0x4f PF: > { %s15_s19 = sadd.s32 1, %s765_s19   ;;  %s901_s15 = smov %s753_s16 }
  0x50   : > { %p12_p10 = scmp.ge.s32.totalorder %s15_s19, 4   ;;  %s902_s16 = smov %s827_s23 }
  0x51   : > { %s903_s17 = smov %s761_s18  ;;  %s904_s18 = smov %s906_s20 }
  0x52   :  { %14 = sbr.rel (!%p12_p10) target bundleno = 3 (0x3), region = 128 }

</bundles_post_ra>
